<compile_context>
chip_gen: v6e
topology: v6e:2x2x1
jax: 0.10.0
libtpu: 0.0.40
codegen_flags: <defaults>
</compile_context>

<pallas_src>
import functools

import jax
import jax.numpy as jnp
from jax.experimental import pallas as pl
from jax.experimental.pallas import tpu as pltpu

# ----- small synthetic "Args" consistent with the module ------------------
MAX_NUM_DRONES = 4
TRAJECTORY_LENGTH = 8
OBS_SHAPE = (4,)            # per-agent, per-step observation
ACTION_SHAPE = (2,)         # per-agent action
CRITIC_MODEL_SIZE = 128     # args.critic_model_size (kept small for the demo)
NUM_ATOMS = 51              # args.num_atoms
USE_ACTIVE_AGENTS = True    # args.critic_use_active_agents
BATCH = 32

OBS_DIM = OBS_SHAPE[0] * MAX_NUM_DRONES * TRAJECTORY_LENGTH     # 128
ACT_DIM = ACTION_SHAPE[0] * MAX_NUM_DRONES                      # 8
IN_DIM = OBS_DIM + ACT_DIM + (1 if USE_ACTIVE_AGENTS else 0)    # 137
H = CRITIC_MODEL_SIZE
AUX_W = 16                                                      # [a | n | zeros]
NUM_ATOMS_P = ((NUM_ATOMS + 127) // 128) * 128                  # 128 (lane-dense)


# ----- Pallas kernel: fused 3-layer MLP + (log_)softmax -------------------
def _critic_kernel(x_ref, aux_ref, w1o_ref, w1x_ref, b1_ref,
                   w2_ref, b2_ref, w3_ref, b3_ref, out_ref, *, log):
    # fc1: obs block (tb,128)@(128,H) + aux block (tb,16)@(16,H); aux carries
    # [actions | active_agents | zero pad] so everything is tile-aligned and on
    # the MXU. Operands are bf16, accumulation f32.
    h1 = jnp.dot(x_ref[...], w1o_ref[...], preferred_element_type=jnp.float32)
    h1 += jnp.dot(aux_ref[...], w1x_ref[...], preferred_element_type=jnp.float32)
    h1 = jnp.maximum(h1 + b1_ref[...], 0.0)            # bias/relu in f32 (VPU)
    h1 = h1.astype(jnp.bfloat16)

    h2 = jnp.maximum(
        jnp.dot(h1, w2_ref[...], preferred_element_type=jnp.float32) + b2_ref[...],
        0.0).astype(jnp.bfloat16)

    # fc3 padded to 128 output columns (padded bias = -1e30 -> exp underflows to
    # exactly 0, so the softmax over 128 lanes equals the softmax over 51 atoms).
    logits = jnp.dot(h2, w3_ref[...], preferred_element_type=jnp.float32) + b3_ref[...]

    # numerically-stable (log_)softmax along the (padded) atom axis
    m = jnp.max(logits, axis=-1, keepdims=True)
    z = logits - m
    e = jnp.exp(z)
    s = jnp.sum(e, axis=-1, keepdims=True)
    if log:
        out_ref[...] = z - jnp.log(s)
    else:
        out_ref[...] = e / s          # exact divide: rows sum to 1 (f32 exact)


def _pick_tile(batch, block_b):
    """Batch tile: multiple of 8 sublanes, dividing B when possible (no
    pad/slice HBM roundtrip), and >=2 grid steps so v7x's 2 TCs both work."""
    if batch <= 8:
        return batch                                   # single full-batch tile
    cap = max(8, (min(block_b, batch) // 8) * 8)
    if cap >= batch and batch >= 16:                   # guarantee >=2 grid steps
        cap = max(8, ((batch // 2) // 8) * 8)
    for tb in range(cap, 7, -8):                       # prefer tile dividing B
        if batch % tb == 0:
            return tb
    return cap                                         # ragged: pad below


def critic_forward(x, a, active_agents, params, *, log=False, block_b=512):
    """x: (B, OBS_DIM), a: (B, ACT_DIM), active_agents: (B, 1), all f32."""
    w1o, w1x, b1, w2, b2, w3, b3 = params
    B = x.shape[0]

    # fold action + active_agents (+ zero pad) into one 16-wide aligned block
    aux = jnp.concatenate(
        [a, active_agents, jnp.zeros((B, AUX_W - ACT_DIM - 1), a.dtype)], axis=1)
    # bf16 streamed activations: full-rate MXU + halved HBM read of batch tiles
    x = x.astype(jnp.bfloat16)
    aux = aux.astype(jnp.bfloat16)

    tb = _pick_tile(B, block_b)
    Bp = pl.cdiv(B, tb) * tb
    if Bp != B:
        pad = ((0, Bp - B), (0, 0))
        x = jnp.pad(x, pad)
        aux = jnp.pad(aux, pad)
    grid = (Bp // tb,)

    def batch_spec(cols):
        return pl.BlockSpec((tb, cols), lambda i: (i, 0))

    def resident_spec(arr):
        # same block index every grid step -> stays resident in VMEM (~100 KB)
        return pl.BlockSpec(arr.shape, lambda i: (0, 0))

    weight_elems = OBS_DIM * H + AUX_W * H + H * H + H * NUM_ATOMS_P
    cost = pl.CostEstimate(
        flops=2 * Bp * (OBS_DIM * H + AUX_W * H + H * H + H * NUM_ATOMS_P),
        transcendentals=Bp * NUM_ATOMS_P,
        bytes_accessed=(Bp * (OBS_DIM + AUX_W) * 2          # bf16 inputs
                        + Bp * NUM_ATOMS_P * 4              # f32 output
                        + weight_elems * 2                  # bf16 weights
                        + (2 * H + NUM_ATOMS_P) * 4))       # f32 biases

    kernel = functools.partial(_critic_kernel, log=log)
    out = pl.pallas_call(
        kernel,
        out_shape=jax.ShapeDtypeStruct((Bp, NUM_ATOMS_P), jnp.float32),
        grid=grid,
        in_specs=[
            batch_spec(OBS_DIM),
            batch_spec(AUX_W),
            resident_spec(w1o), resident_spec(w1x), resident_spec(b1),
            resident_spec(w2), resident_spec(b2),
            resident_spec(w3), resident_spec(b3),
        ],
        out_specs=batch_spec(NUM_ATOMS_P),
        compiler_params=pltpu.CompilerParams(
            dimension_semantics=("parallel",)),
        cost_estimate=cost,
    )(x, aux, w1o, w1x, b1, w2, b2, w3, b3)
    return out[:B, :NUM_ATOMS]


# ----- deterministic parameter init (PyTorch-Linear-style uniform) --------
def init_params(key):
    def linear(key, fan_in, fan_out):
        k_w, k_b = jax.random.split(key)
        bound = 1.0 / jnp.sqrt(fan_in)
        w = jax.random.uniform(k_w, (fan_in, fan_out), jnp.float32, -bound, bound)
        b = jax.random.uniform(k_b, (1, fan_out), jnp.float32, -bound, bound)
        return w, b

    k1, k2, k3 = jax.random.split(key, 3)
    w1, b1 = linear(k1, IN_DIM, H)
    w2, b2 = linear(k2, H, H)
    w3, b3 = linear(k3, H, NUM_ATOMS)

    # kernel packing: split fc1 (obs rows aligned to 128, [act|n|0] rows -> 16),
    # pad fc3 to 128 lane-dense output columns, store weights as bf16
    w1_obs = w1[:OBS_DIM].astype(jnp.bfloat16)                       # (128, H)
    w1_aux = jnp.zeros((AUX_W, H), jnp.float32)
    w1_aux = w1_aux.at[:ACT_DIM + 1].set(w1[OBS_DIM:]).astype(jnp.bfloat16)
    w3_p = jnp.zeros((H, NUM_ATOMS_P), jnp.float32)
    w3_p = w3_p.at[:, :NUM_ATOMS].set(w3).astype(jnp.bfloat16)
    b3_p = jnp.full((1, NUM_ATOMS_P), -1e30, jnp.float32)            # finite!
    b3_p = b3_p.at[:, :NUM_ATOMS].set(b3)

    kernel_params = (w1_obs, w1_aux, b1, w2.astype(jnp.bfloat16), b2, w3_p, b3_p)
    ref_params = (w1, b1, w2, b2, w3, b3)
    return kernel_params, ref_params


# ----- references -----------------------------------------------------------
def critic_ref_mixed(x, a, n, params, *, log=False):
    """Mirrors the kernel's mixed-precision math exactly (bf16 MXU operands)."""
    w1o, w1x, b1, w2, b2, w3, b3 = params
    B = x.shape[0]
    aux = jnp.concatenate([a, n, jnp.zeros((B, AUX_W - ACT_DIM - 1), x.dtype)], 1)
    xb, auxb = x.astype(jnp.bfloat16), aux.astype(jnp.bfloat16)
    h1 = (jnp.dot(xb, w1o, preferred_element_type=jnp.float32)
          + jnp.dot(auxb, w1x, preferred_element_type=jnp.float32))
    h1 = jax.nn.relu(h1 + b1).astype(jnp.bfloat16)
    h2 = jax.nn.relu(
        jnp.dot(h1, w2, preferred_element_type=jnp.float32) + b2).astype(jnp.bfloat16)
    logits = (jnp.dot(h2, w3, preferred_element_type=jnp.float32) + b3)[:, :NUM_ATOMS]
    return (jax.nn.log_softmax(logits, axis=-1) if log
            else jax.nn.softmax(logits, axis=-1))


def critic_ref_f32(x, a, n, ref_params, *, log=False):
    """Literal f32 translation of the PyTorch module (concat form)."""
    w1, b1, w2, b2, w3, b3 = ref_params
    xcat = jnp.concatenate([x, a, n], axis=1)
    h1 = jax.nn.relu(xcat @ w1 + b1)
    h2 = jax.nn.relu(h1 @ w2 + b2)
    logits = h2 @ w3 + b3
    return (jax.nn.log_softmax(logits, axis=-1) if log
            else jax.nn.softmax(logits, axis=-1))


if __name__ == "__main__":
    key = jax.random.PRNGKey(0)
    k_p, k_x, k_a, k_n = jax.random.split(key, 4)

    params, ref_params = init_params(k_p)
    x = jax.random.normal(k_x, (BATCH, OBS_DIM), jnp.float32)
    a = jax.random.uniform(k_a, (BATCH, ACT_DIM), jnp.float32, -1.0, 1.0)
    active_agents = jax.random.randint(
        k_n, (BATCH, 1), 1, MAX_NUM_DRONES + 1).astype(jnp.float32)

    out = jax.block_until_ready(
        critic_forward(x, a, active_agents, params, log=False))
    out_log = jax.block_until_ready(
        critic_forward(x, a, active_agents, params, log=True))

    ref = critic_ref_mixed(x, a, active_agents, params, log=False)
    ref_log = critic_ref_mixed(x, a, active_agents, params, log=True)
    ref_f32 = critic_ref_f32(x, a, active_agents, ref_params, log=False)

    assert out.shape == (BATCH, NUM_ATOMS)
    # exact divide in the kernel -> rows sum to 1 at f32 precision
    assert jnp.allclose(jnp.sum(out, axis=-1), 1.0, atol=1e-3)
    # matches the mixed-precision reference tightly
    assert jnp.allclose(out, ref, atol=2e-3)
    assert jnp.allclose(out_log, ref_log, atol=2e-3, rtol=1e-3)
    # and the original f32 forward within bf16 error budget
    assert jnp.allclose(out, ref_f32, atol=2e-2)

    print("KERNEL_OK")
</pallas_src>

<mosaic_0001>
module attributes {stable_mosaic.version = 11 : i64} {
  func.func @_critic_kernel(%arg0: i32, %arg1: memref<16x128xbf16, #tpu.memory_space<vmem>>, %arg2: memref<16x16xbf16, #tpu.memory_space<vmem>>, %arg3: memref<128x128xbf16, #tpu.memory_space<vmem>>, %arg4: memref<16x128xbf16, #tpu.memory_space<vmem>>, %arg5: memref<1x128xf32, #tpu.memory_space<vmem>>, %arg6: memref<128x128xbf16, #tpu.memory_space<vmem>>, %arg7: memref<1x128xf32, #tpu.memory_space<vmem>>, %arg8: memref<128x128xbf16, #tpu.memory_space<vmem>>, %arg9: memref<1x128xf32, #tpu.memory_space<vmem>>, %arg10: memref<16x128xf32, #tpu.memory_space<vmem>>) attributes {dimension_semantics = [#tpu.dimension_semantics<parallel>], iteration_bounds = array<i64: 2>, scalar_prefetch = 0 : i64, scratch_operands = 0 : i64, tpu.core_type = #tpu.core_type<tc>, window_params = [{transform_indices = @transform_0, window_bounds = array<i64: 16, 128>}, {transform_indices = @transform_1, window_bounds = array<i64: 16, 16>}, {pipeline_mode = #tpu.pipeline_mode<synchronous>, transform_indices = @transform_2, window_bounds = array<i64: 128, 128>}, {pipeline_mode = #tpu.pipeline_mode<synchronous>, transform_indices = @transform_3, window_bounds = array<i64: 16, 128>}, {pipeline_mode = #tpu.pipeline_mode<synchronous>, transform_indices = @transform_4, window_bounds = array<i64: 1, 128>}, {pipeline_mode = #tpu.pipeline_mode<synchronous>, transform_indices = @transform_5, window_bounds = array<i64: 128, 128>}, {pipeline_mode = #tpu.pipeline_mode<synchronous>, transform_indices = @transform_6, window_bounds = array<i64: 1, 128>}, {pipeline_mode = #tpu.pipeline_mode<synchronous>, transform_indices = @transform_7, window_bounds = array<i64: 128, 128>}, {pipeline_mode = #tpu.pipeline_mode<synchronous>, transform_indices = @transform_8, window_bounds = array<i64: 1, 128>}, {transform_indices = @transform_9, window_bounds = array<i64: 16, 128>}]} {
    %c0 = arith.constant 0 : index
    %c0_0 = arith.constant 0 : index
    %0 = vector.load %arg1[%c0, %c0_0] : memref<16x128xbf16, #tpu.memory_space<vmem>>, vector<16x128xbf16>
    %c0_1 = arith.constant 0 : index
    %c0_2 = arith.constant 0 : index
    %1 = vector.load %arg3[%c0_1, %c0_2] : memref<128x128xbf16, #tpu.memory_space<vmem>>, vector<128x128xbf16>
    %cst = arith.constant dense<0.000000e+00> : vector<16x128xf32>
    %2 = tpu.matmul %0, %1, %cst {dimension_numbers = #tpu.dot_dimension_numbers<[1], [0], [0], [1], [0, 0, 1, 1], [], []>} : vector<16x128xbf16>, vector<128x128xbf16>, vector<16x128xf32> -> vector<16x128xf32>
    %c0_3 = arith.constant 0 : index
    %c0_4 = arith.constant 0 : index
    %3 = vector.load %arg2[%c0_3, %c0_4] : memref<16x16xbf16, #tpu.memory_space<vmem>>, vector<16x16xbf16>
    %c0_5 = arith.constant 0 : index
    %c0_6 = arith.constant 0 : index
    %4 = vector.load %arg4[%c0_5, %c0_6] : memref<16x128xbf16, #tpu.memory_space<vmem>>, vector<16x128xbf16>
    %cst_7 = arith.constant dense<0.000000e+00> : vector<16x128xf32>
    %5 = tpu.matmul %3, %4, %cst_7 {dimension_numbers = #tpu.dot_dimension_numbers<[1], [0], [0], [1], [0, 0, 1, 1], [], []>} : vector<16x16xbf16>, vector<16x128xbf16>, vector<16x128xf32> -> vector<16x128xf32>
    %6 = arith.addf %2, %5 : vector<16x128xf32>
    %c0_8 = arith.constant 0 : index
    %c0_9 = arith.constant 0 : index
    %7 = vector.load %arg5[%c0_8, %c0_9] : memref<1x128xf32, #tpu.memory_space<vmem>>, vector<1x128xf32>
    %8 = vector.broadcast %7 : vector<1x128xf32> to vector<16x128xf32>
    %9 = arith.addf %6, %8 : vector<16x128xf32>
    %cst_10 = arith.constant 0.000000e+00 : f32
    %10 = vector.broadcast %cst_10 : f32 to vector<16x128xf32>
    %11 = arith.maximumf %9, %10 : vector<16x128xf32>
    %12 = arith.truncf %11 : vector<16x128xf32> to vector<16x128xbf16>
    %c0_11 = arith.constant 0 : index
    %c0_12 = arith.constant 0 : index
    %13 = vector.load %arg6[%c0_11, %c0_12] : memref<128x128xbf16, #tpu.memory_space<vmem>>, vector<128x128xbf16>
    %cst_13 = arith.constant dense<0.000000e+00> : vector<16x128xf32>
    %14 = tpu.matmul %12, %13, %cst_13 {dimension_numbers = #tpu.dot_dimension_numbers<[1], [0], [0], [1], [0, 0, 1, 1], [], []>} : vector<16x128xbf16>, vector<128x128xbf16>, vector<16x128xf32> -> vector<16x128xf32>
    %c0_14 = arith.constant 0 : index
    %c0_15 = arith.constant 0 : index
    %15 = vector.load %arg7[%c0_14, %c0_15] : memref<1x128xf32, #tpu.memory_space<vmem>>, vector<1x128xf32>
    %16 = vector.broadcast %15 : vector<1x128xf32> to vector<16x128xf32>
    %17 = arith.addf %14, %16 : vector<16x128xf32>
    %cst_16 = arith.constant 0.000000e+00 : f32
    %18 = vector.broadcast %cst_16 : f32 to vector<16x128xf32>
    %19 = arith.maximumf %17, %18 : vector<16x128xf32>
    %20 = arith.truncf %19 : vector<16x128xf32> to vector<16x128xbf16>
    %c0_17 = arith.constant 0 : index
    %c0_18 = arith.constant 0 : index
    %21 = vector.load %arg8[%c0_17, %c0_18] : memref<128x128xbf16, #tpu.memory_space<vmem>>, vector<128x128xbf16>
    %cst_19 = arith.constant dense<0.000000e+00> : vector<16x128xf32>
    %22 = tpu.matmul %20, %21, %cst_19 {dimension_numbers = #tpu.dot_dimension_numbers<[1], [0], [0], [1], [0, 0, 1, 1], [], []>} : vector<16x128xbf16>, vector<128x128xbf16>, vector<16x128xf32> -> vector<16x128xf32>
    %c0_20 = arith.constant 0 : index
    %c0_21 = arith.constant 0 : index
    %23 = vector.load %arg9[%c0_20, %c0_21] : memref<1x128xf32, #tpu.memory_space<vmem>>, vector<1x128xf32>
    %24 = vector.broadcast %23 : vector<1x128xf32> to vector<16x128xf32>
    %25 = arith.addf %22, %24 : vector<16x128xf32>
    %cst_22 = arith.constant dense<0xFF800000> : vector<16xf32>
    %26 = vector.multi_reduction <maximumf>, %25, %cst_22 [1] : vector<16x128xf32> to vector<16xf32>
    %27 = vector.shape_cast %26 : vector<16xf32> to vector<16x1xf32>
    %28 = vector.broadcast %27 : vector<16x1xf32> to vector<16x128xf32>
    %29 = arith.subf %25, %28 : vector<16x128xf32>
    %30 = math.exp %29 : vector<16x128xf32>
    %cst_23 = arith.constant dense<0.000000e+00> : vector<16xf32>
    %31 = vector.multi_reduction <add>, %30, %cst_23 [1] : vector<16x128xf32> to vector<16xf32>
    %32 = vector.shape_cast %31 : vector<16xf32> to vector<16x1xf32>
    %33 = vector.broadcast %32 : vector<16x1xf32> to vector<16x128xf32>
    %34 = arith.divf %30, %33 : vector<16x128xf32>
    %c0_24 = arith.constant 0 : index
    %c0_25 = arith.constant 0 : index
    %35 = vector.load %arg10[%c0_24, %c0_25] : memref<16x128xf32, #tpu.memory_space<vmem>>, vector<16x128xf32>
    tpu.vector_store %arg10[%c0_24, %c0_25], %34 {strides = array<i32>} : memref<16x128xf32, #tpu.memory_space<vmem>>, vector<16x128xf32>,
    return
  }
  func.func @transform_0(%arg0: i32) -> (i32, i32) {
    %c0_i32 = arith.constant 0 : i32
    %c0_i32_0 = arith.constant 0 : i32
    return %arg0, %c0_i32 : i32, i32
  }
  func.func @transform_1(%arg0: i32) -> (i32, i32) {
    %c0_i32 = arith.constant 0 : i32
    %c0_i32_0 = arith.constant 0 : i32
    return %arg0, %c0_i32 : i32, i32
  }
  func.func @transform_2(%arg0: i32) -> (i32, i32) {
    %c0_i32 = arith.constant 0 : i32
    %c0_i32_0 = arith.constant 0 : i32
    %c0_i32_1 = arith.constant 0 : i32
    return %c0_i32, %c0_i32_0 : i32, i32
  }
  func.func @transform_3(%arg0: i32) -> (i32, i32) {
    %c0_i32 = arith.constant 0 : i32
    %c0_i32_0 = arith.constant 0 : i32
    %c0_i32_1 = arith.constant 0 : i32
    return %c0_i32, %c0_i32_0 : i32, i32
  }
  func.func @transform_4(%arg0: i32) -> (i32, i32) {
    %c0_i32 = arith.constant 0 : i32
    %c0_i32_0 = arith.constant 0 : i32
    %c0_i32_1 = arith.constant 0 : i32
    return %c0_i32, %c0_i32_0 : i32, i32
  }
  func.func @transform_5(%arg0: i32) -> (i32, i32) {
    %c0_i32 = arith.constant 0 : i32
    %c0_i32_0 = arith.constant 0 : i32
    %c0_i32_1 = arith.constant 0 : i32
    return %c0_i32, %c0_i32_0 : i32, i32
  }
  func.func @transform_6(%arg0: i32) -> (i32, i32) {
    %c0_i32 = arith.constant 0 : i32
    %c0_i32_0 = arith.constant 0 : i32
    %c0_i32_1 = arith.constant 0 : i32
    return %c0_i32, %c0_i32_0 : i32, i32
  }
  func.func @transform_7(%arg0: i32) -> (i32, i32) {
    %c0_i32 = arith.constant 0 : i32
    %c0_i32_0 = arith.constant 0 : i32
    %c0_i32_1 = arith.constant 0 : i32
    return %c0_i32, %c0_i32_0 : i32, i32
  }
  func.func @transform_8(%arg0: i32) -> (i32, i32) {
    %c0_i32 = arith.constant 0 : i32
    %c0_i32_0 = arith.constant 0 : i32
    %c0_i32_1 = arith.constant 0 : i32
    return %c0_i32, %c0_i32_0 : i32, i32
  }
  func.func @transform_9(%arg0: i32) -> (i32, i32) {
    %c0_i32 = arith.constant 0 : i32
    %c0_i32_0 = arith.constant 0 : i32
    return %arg0, %c0_i32 : i32, i32
  }
}

</mosaic_0001>

<bundles_post_ra>
// kernel: tpu_custom_call.1
= control target key start
LH: loop header
LB: loop body
LE: loop exit
PB: predicated region body
PF: predicated region fallthrough
CT: control target
= control target key end

     0   :  { %14 = vsyncpa [#allocation3], 0  ;;  %s1616_s0 = inlined_call_operand.vmem [shape: bf16[32,128], index: 0, kind: input, shape index: {}]   ;;  %s1617_s1 = inlined_call_operand.vmem [shape: bf16[32,16], index: 1, kind: input, shape index: {}]   ;;  %s1618_s2 = inlined_call_operand.hbm [shape: bf16[128,128], index: 2, kind: input, shape index: {}]   ;;  %s1619_s3 = inlined_call_operand.vmem [shape: bf16[16,128], index: 3, kind: input, shape index: {}]   ;;  %s1620_s4 = inlined_call_operand.vmem [shape: f32[1,128], index: 4, kind: input, shape index: {}]   ;;  %s1621_s5 = inlined_call_operand.hbm [shape: bf16[128,128], index: 5, kind: input, shape index: {}]   ;;  %s1622_s6 = inlined_call_operand.vmem [shape: f32[1,128], index: 6, kind: input, shape index: {}]   ;;  %s1623_s7 = inlined_call_operand.hbm [shape: bf16[128,128], index: 7, kind: input, shape index: {}]   ;;  %s1624_s8 = inlined_call_operand.vmem [shape: f32[1,128], index: 8, kind: input, shape index: {}]   ;;  %s1625_s9 = inlined_call_operand.hbm [shape: f32[32,128], index: 9, kind: output, shape index: {}]  }
   0x1   :  { %15 = vsyncpa [#allocation6], 0 }
   0x2   :  { %16 = vsyncpa [#allocation4], 0 }
   0x3   :  { %18 = vsyncpa [#allocation4 + $0x1], 0  ;;  %s1418_s30 = smov 0   ;;  %s1420_s10 = smov 0  }
   0x4   :  { %s1422_s11 = smov 0   ;;  %s1424_s12 = smov 0  }
   0x5 LB: > { %s1439_s13 = sadd.s32 4294967295, %s1356_s12   ;;  %s952_s14 = sadd.s32 4294967294, %s1356_s12   ;;  %s1356_s12 = sphi %s1424_s12, %s1641_s12   ;;  %s1352_s11 = sphi %s1422_s11, %s1640_s11   ;;  %s1348_s10 = sphi %s1420_s10, %s1639_s10   ;;  %s1344_s30 = sphi %s1418_s30, %s1638_s30  }
   0x6   : > { %s1443_s15 = sadd.s32 1, %s1356_s12   ;;  %s230_s16 = sadd.s32 1, %s1352_s11 }
   0x7   : > { %s227_s17 = ssub.s32 %s1356_s12, %s1443_s15  ;;  %p240_p0 = scmp.ne.s32.totalorder %s1352_s11, %s1348_s10 }
   0x8   : > { %p228_p1 = scmp.eq.s32.totalorder %s227_s17, 0  ;;  %p241_p2 = scmp.eq.s32.totalorder %s1439_s13, 1 }
   0x9   : > { %p246_p3 = scmp.ne.s32.totalorder %s1348_s10, %s1344_s30  ;;  %p247_p4 = scmp.eq.s32.totalorder %s952_s14, 1 }
   0xa   : > { %s1454_s18 = scalar_select %p228_p1, %s1352_s11, %s230_s16  }
   0xb   : > { %p1456_p5 = por %p241_p2, %p240_p0  ;;  %p1460_p6 = por %p247_p4, %p246_p3 }
   0xc   : > { %p953_p7 = scmp.ge.s32.totalorder %s1356_s12, 1  ;;  %p254_p8 = scmp.lt.s32.totalorder %s1356_s12, 3 }
   0xd   : > { %s1628_s19 = scalar_select %p1456_p5, 1, 0 }
   0xe   : > { %s1629_s20 = scalar_select %p1460_p6, 1, 0 }
   0xf   : > { %p1626_p9 = scmp.eq.s32.totalorder %s1439_s13, 0  ;;  %p1467_p10 = pnand %p953_p7, %p254_p8 }
  0x10   : > { %s1358_s22 = smov [#allocation5]   ;;  %s1359_s25 = smov [#allocation2]  }
  0x11   : > { %p1113_p11 = pneg %p1467_p10  ;;  %s285_s23 = sshll.u32 %s1358_s22, 4  ;;  %s286_s23 = int_to_ptr.vmem [resolvable:$true] %s285_s23 }
  0x12   : > { %s266_s26 = sshll.u32 %s1359_s25, 4  ;;  %s1360_s27 = smov [#allocation7]   ;;  %s267_s26 = int_to_ptr.vmem [resolvable:$true] %s266_s26 }
  0x13   : > { %p1475_p12 = pnand %p1626_p9, %p1113_p11  ;;  %s301_s28 = sshll.u32 %s1360_s27, 4  ;;  %s302_s28 = int_to_ptr.vmem [resolvable:$true] %s301_s28 }
  0x14   : > { %s1221_s29 = scalar_lea.vmem %s286_s23, 1024  ;;  %p1229_p3 = scmp.lt.s32.totalorder %s286_s23, %s286_s23 }
  0x15   : > { %p1212_p13 = pneg %p1475_p12  ;;  %p1222_p0 = scmp.ne.s32.totalorder %s286_s23, %s1221_s29 }
  0x16   : > { %p1230_p4 = scmp.lt.s32.totalorder %s1221_s29, %s1221_s29 }
  0x17   : > { %p1224_p1 = pnand %p1222_p0, %p1212_p13 }
  0x18   : > { %p1231_p7 = por %p1230_p4, %p1229_p3 }
  0x19   : > { %p1225_p2 = pneg %p1224_p1 }
  0x1b   : > { %p1232_p8 = pnand %p1231_p7, %p1225_p2 }
  0x1d   : > { %1235 = shalt.err (!%p1232_p8)
}
  0x1e   : > { %s1361_s14 = smov 64   ;;  %s1362_s16 = smov 4  }
  0x1f   : > { %1119 = dma.hbm_to_vmem [thread:$0]  (!%p1475_p12), %s1621_s5, 1024, %s286_s23, [#allocation6], %s1361_s14, %s1361_s14, %s1362_s16  }
  0x20   : > { %s1247_s25 = scalar_lea.vmem %s267_s26, 1024  ;;  %p1255_p9 = scmp.lt.s32.totalorder %s267_s26, %s267_s26 }
  0x21   : > { %p1248_p11 = scmp.ne.s32.totalorder %s267_s26, %s1247_s25  ;;  %p1256_p6 = scmp.lt.s32.totalorder %s1247_s25, %s1247_s25 }
  0x23   : > { %p1250_p0 = pnand %p1248_p11, %p1212_p13  ;;  %p1257_p3 = por %p1256_p6, %p1255_p9 }
  0x25   : > { %p1251_p1 = pneg %p1250_p0 }
  0x27   : > { %p1258_p2 = pnand %p1257_p3, %p1251_p1 }
  0x29   : > { %1261 = shalt.err (!%p1258_p2)
}
  0x2a   : > { %1116 = dma.hbm_to_vmem [thread:$0]  (!%p1475_p12), %s1618_s2, 1024, %s267_s26, [#allocation3], %s1361_s14, %s1361_s14, %s1362_s16  }
  0x2b   : > { %s1273_s23 = scalar_lea.vmem %s302_s28, 1024  ;;  %p1281_p11 = scmp.lt.s32.totalorder %s302_s28, %s302_s28 }
  0x2c   : > { %p1274_p4 = scmp.ne.s32.totalorder %s302_s28, %s1273_s23  ;;  %p1282_p0 = scmp.lt.s32.totalorder %s1273_s23, %s1273_s23 }
  0x2e   : > { %p1276_p7 = pnand %p1274_p4, %p1212_p13  ;;  %p1283_p5 = por %p1282_p0, %p1281_p11 }
  0x30   : > { %p1277_p8 = pneg %p1276_p7 }
  0x32   : > { %p1284_p6 = pnand %p1283_p5, %p1277_p8 }
  0x34   : > { %1287 = shalt.err (!%p1284_p6)
}
  0x35   : > { %1122 = dma.hbm_to_vmem [thread:$0]  (!%p1475_p12), %s1623_s7, 1024, %s302_s28, [#allocation6], %s1361_s14, %s1361_s14, %s1362_s16  }
  0x36   : > { %338 = sbr.rel (%p1467_p10) target bundleno = 1028 (0x404), region = 56  ;;  %p1632_p9 = scmp.eq.s32.totalorder (!%p1467_p10), %s1439_s13, 0 }
  0x3b   : > { %1331 = dma.done.wait (%p1632_p9), [#allocation3], 1024   ;;  %p1633_p13 = pmov %p1632_p9 }
  0x3c   : > { %p1634_p1 = pmov %p1632_p9 }
  0x3d   : > { %1333 = vsyncadd (%p1633_p13), [#allocation3], 4294966272 }
  0x3e   : > { %1335 = dma.done.wait (%p1634_p1), [#allocation6], 2048   ;;  %p1635_p5 = pmov %p1634_p1 }
  0x3f   : > { %s963_s24 = sshll.u32 %s1439_s13, 1  ;;  %v1363_v0 = vmov 0.0   ;;  %vm1364_vm0 = vmmov 0   ;;  %v1175_v1 = vld [vmem:[#allocation2 + $0x38] sm:$0xff]   ;;  %v1176_v2 = vld [vmem:[#allocation2 + $0x30] sm:$0xff]   ;;  %v1177_v3 = vld [vmem:[#allocation2 + $0x28] sm:$0xff]  }
  0x40   : > { %1337 = vsyncadd (%p1635_p5), [#allocation6], 4294965248  ;;  %1039 = vmatprep.subr.bf16.mxu1 %v1363_v0  ;;  %1033 = vmatprep.subr.bf16.mxu0 %v1363_v0  ;;  %p388_p10 = scmp.lt.s32.totalorder %s963_s24, 3  ;;  %v1181_v4 = vld [vmem:[%s1619_s3] sm:$0xff]   ;;  %vm434_vm1 = vcmask 130048   ;;  %v1186_v7 = vld [vmem:[#allocation5 + $0x38] sm:$0xff]  }
  0x41   : > { %1035 = vmatprep.mubr.msk.bf16.mxu0 %vm1364_vm0, %v1363_v0  ;;  %1055 = vmatprep.mubr.msk.bf16.mxu1 %vm1364_vm0, %v1363_v0  ;;  %v1178_v6 = vld [vmem:[#allocation2 + $0x20] sm:$0xff]   ;;  %v1179_v8 = vld [vmem:[#allocation2 + $0x18] sm:$0xff]   ;;  %v1187_v9 = vld [vmem:[#allocation5 + $0x30] sm:$0xff]   ;;  %s1003_s25 = sshll.u32 %s1439_s13, 8  ;;  %p1636_p3 = scmp.ne.s32.totalorder %s1628_s19, 0 }
  0x42   : > { %s1643_s24 = smov (!%p388_p10, %s963_s24), 3  ;;  %1040 = vmatpush3.bf16.msra.mxu1 %v1175_v1  ;;  %1034 = vmatpush3.bf16.msra.mxu0 %v1181_v4  ;;  %v1188_v10 = vld [vmem:[#allocation5 + $0x28] sm:$0xff]   ;;  %v1180_v11 = vld [vmem:[#allocation2 + $0x10] sm:$0xff]   ;;  %v1184_v13 = vld [vmem:[#allocation2] sm:$0xff]   ;;  %s1572_s22 = scalar_lea.hbm %s1625_s9, %s1003_s25 }
  0x43   : > { %s964_s21 = sshll.u32 %s1643_s24, 2  ;;  %1041 = vmatprep.subr.bf16.mxu1 %v1363_v0  ;;  %1059 = vmatprep.subr.bf16.mxu0 %v1363_v0  ;;  %v1182_v12 = vld [vmem:[#allocation2 + $0x8] sm:$0xff]   ;;  %v1189_v15 = vld [vmem:[#allocation5 + $0x20] sm:$0xff]   ;;  %v1190_v16 = vld [vmem:[#allocation5 + $0x18] sm:$0xff]   ;;  %s1365_s13 = smov [#allocation8]  }
  0x44   : > { %s397_s14 = scalar_lea.vmem %s1617_s1, %s964_s21  ;;  %s391_s23 = scalar_lea.vmem %s1616_s0, %s964_s21  ;;  %v1191_v17 = vld [vmem:[#allocation5 + $0x10] sm:$0xff]   ;;  %v1192_v18 = vld [vmem:[#allocation5 + $0x8] sm:$0xff]   ;;  %v1193_v19 = vld [vmem:[#allocation5] sm:$0xff]  }
  0x45   : > { %v1183_v5 = vld [vmem:[%s397_s14] sm:$0xff]   ;;  %v1194_v20 = vld [vmem:[#allocation7 + $0x38] sm:$0xff]   ;;  %v1195_v21 = vld [vmem:[#allocation7 + $0x30] sm:$0xff]   ;;  %s384_s14 = sand.u32 1, %s1348_s10   ;;  %s1292_s26 = sshll.u32 %s1365_s13, 4  ;;  %s1293_s26 = int_to_ptr.vmem [resolvable:$false] %s1292_s26 }
  0x46   : > { %1042 = vmatpush3.bf16.msra.mxu1 %v1176_v2  ;;  %1036 = vmatmul.mubr.msk.bf16.vlgmr.msra.gmra.mxu0 %vm434_vm1, %v1183_v5  ;;  %v1185_v14 = vld [vmem:[%s391_s23] sm:$0xff]   ;;  %v1196_v22 = vld [vmem:[#allocation7 + $0x28] sm:$0xff]   ;;  %v1198_v24 = vld [vmem:[#allocation7 + $0x18] sm:$0xff]   ;;  %s962_s16 = sshll.u32 %s384_s14, 4  ;;  %s1576_s24 = scalar_lea.sflag [#allocation4], %s384_s14 }
  0x47   : > { %1043 = vmatprep.subr.bf16.mxu1 %v1363_v0  ;;  %1075 = vmatprep.mubr.msk.bf16.mxu0 %vm1364_vm0, %v1363_v0  ;;  %v1197_v23 = vld [vmem:[#allocation7 + $0x20] sm:$0xff]   ;;  %v1199_v41 = vld [vmem:[#allocation7 + $0x10] sm:$0xff]   ;;  %v1200_v42 = vld [vmem:[#allocation7 + $0x8] sm:$0xff]   ;;  %s386_s27 = scalar_lea.vmem [#allocation8], %s962_s16  ;;  %s1294_s28 = scalar_lea.vmem %s1293_s26, 512 }
  0x48   : > { %1060 = vmatpush3.bf16.msra.mxu0 %v1186_v7  ;;  %v979_v31 = vld [vmem:[%s1620_s4] ss:$0 sm:$0xff]  ;;  %s847_s29 = sshll.u32 %s386_s27, 4  ;;  %s1574_s29 = int_to_ptr.vmem [resolvable:$true] %s847_s29 }
  0x49   : > { %1061 = vmatprep.subr.bf16.mxu0 %v1363_v0  ;;  %v1201_v43 = vld [vmem:[#allocation7] sm:$0xff]   ;;  %s1288_s21 = scalar_lea.vmem %s1574_s29, 256  ;;  %p1295_p7 = scmp.lt.s32.totalorder %s1574_s29, %s1293_s26 }
  0x4a   : > { %1044 = vmatpush3.bf16.msra.mxu1 %v1177_v3  ;;  %v980_v44 = vld [vmem:[%s1622_s6] ss:$0 sm:$0xff]  ;;  %p1289_p12 = scmp.ne.s32.totalorder %s1574_s29, %s1288_s21  ;;  %p1296_p8 = scmp.lt.s32.totalorder %s1294_s28, %s1288_s21 }
  0x4b   : > { %1045 = vmatprep.subr.bf16.mxu1 %v1363_v0  ;;  %v989_v54 = vld [vmem:[%s1624_s8] ss:$0 sm:$0xff] }
  0x4c   : > { %1062 = vmatpush3.bf16.msra.mxu0 %v1187_v9  ;;  %p1290_p2 = pnand %p1289_p12, %p1636_p3  ;;  %p1297_p11 = por %p1296_p8, %p1295_p7 }
  0x4d   : > { %1063 = vmatprep.subr.bf16.mxu0 %v1363_v0 }
  0x4e   : > { %1046 = vmatpush3.bf16.msra.mxu1 %v1178_v6  ;;  %p1291_p4 = pneg %p1290_p2 }
  0x4f   : > { %1047 = vmatprep.subr.bf16.mxu1 %v1363_v0 }
  0x50   : > { %1064 = vmatpush3.bf16.msra.mxu0 %v1188_v10  ;;  %p1298_p0 = pnand %p1297_p11, %p1291_p4 }
  0x51   : > { %1065 = vmatprep.subr.bf16.mxu0 %v1363_v0 }
  0x52   : > { %1048 = vmatpush3.bf16.msra.mxu1 %v1179_v8 }
  0x53   : > { %1049 = vmatprep.subr.bf16.mxu1 %v1363_v0 }
  0x54   : > { %1066 = vmatpush3.bf16.msra.mxu0 %v1189_v15 }
  0x55   : > { %1067 = vmatprep.subr.bf16.mxu0 %v1363_v0 }
  0x56   : > { %1050 = vmatpush3.bf16.msra.mxu1 %v1180_v11 }
  0x57   : > { %1051 = vmatprep.subr.bf16.mxu1 %v1363_v0 }
  0x58   : > { %1068 = vmatpush3.bf16.msra.mxu0 %v1190_v16 }
  0x59   : > { %1069 = vmatprep.subr.bf16.mxu0 %v1363_v0 }
  0x5a   : > { %1052 = vmatpush3.bf16.msra.mxu1 %v1182_v12 }
  0x5b   : > { %1053 = vmatprep.subr.bf16.mxu1 %v1363_v0 }
  0x5c   : > { %1070 = vmatpush3.bf16.msra.mxu0 %v1191_v17 }
  0x5d   : > { %1071 = vmatprep.subr.bf16.mxu0 %v1363_v0 }
  0x5e   : > { %1054 = vmatpush3.bf16.msra.mxu1 %v1184_v13 }
  0x5f   : > { %1079 = vmatprep.subr.bf16.mxu1 %v1363_v0 }
  0x60   : > { %1072 = vmatpush3.bf16.msra.mxu0 %v1192_v18 }
  0x61   : > { %1056 = vmatmul.mubr.bf16.vlgmr.msra.gmra.mxu1 %v1185_v14  ;;  %1073 = vmatprep.subr.bf16.mxu0 %v1363_v0 }
  0x62   : > { %1095 = vmatprep.mubr.msk.bf16.mxu1 %vm1364_vm0, %v1363_v0  ;;  %1080 = vmatpush3.bf16.msra.mxu1 %v1194_v20 }
  0x63   : > { %1081 = vmatprep.subr.bf16.mxu1 %v1363_v0 }
  0x64   : > { %1074 = vmatpush3.bf16.msra.mxu0 %v1193_v19 }
  0x66   : > { %1082 = vmatpush3.bf16.msra.mxu1 %v1195_v21 }
  0x67   : > { %1083 = vmatprep.subr.bf16.mxu1 %v1363_v0 }
  0x6a   : > { %1084 = vmatpush3.bf16.msra.mxu1 %v1196_v22 }
  0x6b   : > { %1085 = vmatprep.subr.bf16.mxu1 %v1363_v0 }
  0x6e   : > { %1086 = vmatpush3.bf16.msra.mxu1 %v1197_v23 }
  0x6f   : > { %1087 = vmatprep.subr.bf16.mxu1 %v1363_v0 }
  0x72   : > { %1088 = vmatpush3.bf16.msra.mxu1 %v1198_v24 }
  0x73   : > { %1089 = vmatprep.subr.bf16.mxu1 %v1363_v0 }
  0x76   : > { %1090 = vmatpush3.bf16.msra.mxu1 %v1199_v41 }
  0x77   : > { %1091 = vmatprep.subr.bf16.mxu1 %v1363_v0 }
  0x7a   : > { %1092 = vmatpush3.bf16.msra.mxu1 %v1200_v42 }
  0x7b   : > { %1093 = vmatprep.subr.bf16.mxu1 %v1363_v0 }
  0x7e   : > { %1094 = vmatpush3.bf16.msra.mxu1 %v1201_v43 }
 0x106   : > { %v472_v25 = vpop.f32.mrf.mxu0 }
 0x108   : > { %v1037_v26 = vpop.f32.mrf.mxu0 }
 0x10a   : > { %v475_v27 = vpop.f32.mrf.mxu0 }
 0x10c   : > { %v1038_v28 = vpop.f32.mrf.mxu0 }
 0x121   : > { %v567_v29 = vpop.f32.mrf.mxu1 }
 0x122   : > { %v568_v30 = vadd.f32 %v567_v29, %v472_v25 }
 0x123   : > { %v1057_v32 = vpop.f32.mrf.mxu1 }
 0x124   : > { %v581_v34 = vadd.f32 %v979_v31, %v568_v30 }
 0x125   : > { %v570_v33 = vpop.f32.mrf.mxu1 }
 0x126   : > { %v571_v35 = vadd.f32 %v570_v33, %v475_v27  ;;  %v583_v38 = vmax.f32 %v581_v34, 0.0 }
 0x127   : > { %v1058_v36 = vpop.f32.mrf.mxu1 }
 0x128   : > { %v582_v37 = vadd.f32 %v979_v31, %v571_v35 }
 0x12a   : > { %v584_v39 = vmax.f32 %v582_v37, 0.0 }
 0x12c   : > { %v585_v40 = vpack.c.bf16 %v584_v39, %v583_v38 }
 0x12e   : > { %1076 = vmatmul.mubr.bf16.vlgmr.msra.gmra.mxu0 %v585_v40 }
 0x1ee   : > { %v691_v45 = vpop.f32.mrf.mxu0 }
 0x1ef   : > { %v692_v47 = vadd.f32 %v980_v44, %v691_v45 }
 0x1f0   : > { %v1077_v46 = vpop.f32.mrf.mxu0 }
 0x1f1   : > { %v698_v51 = vmax.f32 %v692_v47, 0.0 }
 0x1f2   : > { %v694_v48 = vpop.f32.mrf.mxu0 }
 0x1f3   : > { %v695_v49 = vadd.f32 %v980_v44, %v694_v48 }
 0x1f4   : > { %v1078_v50 = vpop.f32.mrf.mxu0 }
 0x1f5   : > { %v699_v52 = vmax.f32 %v695_v49, 0.0 }
 0x1f7   : > { %v700_v53 = vpack.c.bf16 %v699_v52, %v698_v51 }
 0x1f9   : > { %1096 = vmatmul.mubr.bf16.vlgmr.msra.gmra.mxu1 %v700_v53 }
 0x2b9   : > { %v806_v55 = vpop.f32.mrf.mxu1 }
 0x2ba   : > { %v807_v56 = vadd.f32 %v989_v54, %v806_v55 }
 0x2bb   : > { %v1097_v57 = vpop.f32.mrf.mxu1 }
 0x2bc   : > { %813 = vmax.xlane.f32.xlu0 %v807_v56 }
 0x2bd   : > { %v809_v58 = vpop.f32.mrf.mxu1 }
 0x2be   : > { %v810_v59 = vadd.f32 %v989_v54, %v809_v58 }
 0x2bf   : > { %v1098_v60 = vpop.f32.mrf.mxu1 }
 0x2c0   : > { %815 = vmax.xlane.f32.xlu0 %v810_v59 }
 0x345   : > { %v814_v61 = vpop.xlane.xlu0 %813 }
 0x346   : > { %v817_v62 = vsub.f32 %v807_v56, %v814_v61 }
 0x348   : > { %v819_v63 = vmul.f32 1.442695, %v817_v62 }
 0x349   : > { %v816_v0 = vpop.xlane.xlu0 %815 }
 0x34a   : > { %1202 = vpow2.f32 %v819_v63  ;;  %v818_v1 = vsub.f32 %v810_v59, %v816_v0 }
 0x34c   : > { %v821_v2 = vmul.f32 1.442695, %v818_v1 }
 0x34e   : > { %1204 = vpow2.f32 %v821_v2 }
 0x357   : > { %v1203_v3 = vpop.eup %1202 }
 0x358   : > { %823 = vadd.xlane.f32.xlu1 %v1203_v3 }
 0x35b   : > { %v1205_v4 = vpop.eup %1204 }
 0x35c   : > { %825 = vadd.xlane.f32.xlu1 %v1205_v4 }
 0x3e1   : > { %v824_v5 = vpop.xlane.xlu1 %823 }
 0x3e2   : > { %1206 = vrcp.f32 %v824_v5 }
 0x3e5   : > { %v826_v6 = vpop.xlane.xlu1 %825 }
 0x3e6   : > { %1208 = vrcp.f32 %v826_v6 }
 0x3ef   : > { %v1207_v7 = vpop.eup %1206 }
 0x3f0   : > { %v828_v8 = vmul.f32 %v1207_v7, %v1203_v3 }
 0x3f2   : > { %831 = vst [vmem:[%s386_s27] sm:$0xff] %v828_v8 }
 0x3f3   : > { %v1209_v9 = vpop.eup %1208 }
 0x3f4   : > { %v830_v10 = vmul.f32 %v1209_v9, %v1205_v4 }
 0x3f6   : > { %832 = vst [vmem:[%s386_s27 + $0x8] sm:$0xff] %v830_v10 }
 0x3f7   : > { %1301 = shalt.err (!%p1298_p0)
}
 0x3f8   : > { %s1302_s14 = scalar_lea.hbm %s1572_s22, 256  ;;  %s1306_s27 = scalar_lea.hbm %s1625_s9, 512 }
 0x3f9   : > { %p1303_p6 = scmp.ne.s32.totalorder %s1572_s22, %s1302_s14  ;;  %p1307_p1 = scmp.lt.s32.totalorder %s1572_s22, %s1625_s9 }
 0x3fa   : > { %p1308_p5 = scmp.lt.s32.totalorder %s1306_s27, %s1302_s14 }
 0x3fb   : > { %p1304_p9 = pnand %p1303_p6, %p1636_p3 }
 0x3fc   : > { %p1309_p10 = por %p1308_p5, %p1307_p1 }
 0x3fd   : > { %p1305_p13 = pneg %p1304_p9 }
 0x3ff   : > { %p1310_p12 = pnand %p1309_p10, %p1305_p13 }
 0x401   : > { %1313 = shalt.err (!%p1310_p12)
}
 0x402   : > { %s1366_s21 = smov 128   ;;  %s1367_s13 = smov 8  }
 0x403   : > { %1111 = dma.vmem_to_hbm [thread:$0]  (%p1636_p3), %s1574_s29, 256, %s1572_s22, %s1576_s24, %s1366_s21, %s1366_s21, %s1367_s13  }
 0x404 PF: > { %p1133_p2 = scmp.ge.s32.totalorder %s1356_s12, 2  ;;  %s862_s26 = sand.u32 1, %s1344_s30  }
 0x405   : > { %p1637_p4 = scmp.ne.s32.totalorder %s1629_s20, 0  ;;  %s863_s28 = scalar_lea.sflag [#allocation4], %s862_s26 }
 0x407   : > { %p1124_p7 = pnand %p1133_p2, %p1637_p4 }
 0x409   : > { %p1125_p8 = pneg %p1124_p7 }
 0x40b   : > { %1339 = dma.done.wait (%p1125_p8), %s863_s28, 256  }
 0x40c   : > { %1341 = vsyncadd (%p1125_p8), %s863_s28, 4294967040  ;;  %p21_p11 = scmp.ge.s32.totalorder %s1443_s15, 4   ;;  %s1638_s30 = smov %s1348_s10 }
 0x40d   : > { %s1639_s10 = smov %s1352_s11  ;;  %s1640_s11 = smov %s1454_s18 }
 0x40e   : > { %s1641_s12 = smov %s1443_s15  ;;  %23 = sbr.rel (!%p21_p11) target bundleno = 5 (0x5), region = 107 }
 0x413   :  { %868 = vsyncpa [#allocation3], 1 }
 0x414   :  { %870 = vsyncpa [#allocation3 + $0x1], 1 }
 0x415   :  { %871 = vsyncpa [#allocation6], 1 }
 0x416   :  { %872 = vsyncpa [#allocation4], 1 }
 0x417   :  { %874 = vsyncpa [#allocation4 + $0x1], 1 }

</bundles_post_ra>
